<compile_context>
chip_gen: v7x
topology: tpu7x:2x2x1
jax: 0.10.0
libtpu: 0.0.40
codegen_flags: <defaults>
</compile_context>

<pallas_src>
import functools

import jax
import jax.numpy as jnp
from jax.experimental import pallas as pl
from jax.experimental.pallas import tpu as pltpu


def _ce_partial_kernel(pred_ref, labels_ref, partial_ref, *, true_n, tile_n):
    """One row-tile of cross-entropy; writes the tile's summed loss.

    pred_ref:    (TILE_N, C)   logits tile, native dtype (cast to f32 here)
    labels_ref:  (TILE_N, 1)   int32 class indices
    partial_ref: (1, 8, 128)   f32 slab; the tile's loss sum broadcast into it
                               (lane-dense, unmasked store)
    """
    i = pl.program_id(0)

    logits = pred_ref[...].astype(jnp.float32)                  # (TILE_N, C)
    labels = labels_ref[...]                                    # (TILE_N, 1)
    tn, c = logits.shape

    # Numerically-stable logsumexp over the class axis.
    m = jnp.max(logits, axis=-1, keepdims=True)                 # (TILE_N, 1)
    lse = m + jnp.log(jnp.sum(jnp.exp(logits - m), axis=-1, keepdims=True))

    # Target logit via one-hot mask (no gather on TPU).
    class_ids = jax.lax.broadcasted_iota(jnp.int32, (tn, c), 1)  # (TILE_N, C)
    onehot = (class_ids == labels).astype(jnp.float32)
    target_logit = jnp.sum(logits * onehot, axis=-1, keepdims=True)

    # Mask rows past the true batch size (N padded up to a multiple of TILE_N).
    row_ids = i * tile_n + jax.lax.broadcasted_iota(jnp.int32, (tn, 1), 0)
    valid = (row_ids < true_n).astype(jnp.float32)

    tile_sum = jnp.sum((lse - target_logit) * valid)             # scalar

    # Lane-dense, unmasked store of the per-tile partial sum.
    partial_ref[...] = jnp.full(partial_ref.shape, tile_sum, dtype=jnp.float32)


def _vmem_capacity_bytes():
    # Trace-time hardware query; fall back to the smallest generation (v7x).
    try:
        return int(pltpu.get_tpu_info().vmem_capacity_bytes)
    except Exception:
        return 64 * 1024 * 1024


def output_layer_loss(prediction, labels):
    """Pallas equivalent of OutputLayer.forward(prediction, labels).

    prediction: (N, C) float logits (any float dtype; DMA'd natively)
    labels:     (N,)   integer class indices
    returns scalar float32 mean cross-entropy loss
    """
    n, c = prediction.shape
    itemsize = jnp.dtype(prediction.dtype).itemsize

    # ---- Tile sizing: keep all double-buffered input tiles within a budget
    # derived from this generation's VMEM (v7x has only 64 MiB physical).
    vmem_cap = _vmem_capacity_bytes()
    input_budget = min(vmem_cap // 4, 32 * 1024 * 1024)
    # Per-row VMEM footprint: compact logits row + labels row padded to 128 lanes.
    per_row_vmem = c * itemsize + 128 * 4
    tile_n = input_budget // (2 * per_row_vmem)          # 2x double buffering
    n_up8 = ((n + 7) // 8) * 8
    tile_n = min(max(tile_n, 8), n_up8)
    tile_n = max(8, (tile_n // 8) * 8)                   # sublane-aligned

    n_pad = ((n + tile_n - 1) // tile_n) * tile_n
    num_tiles = n_pad // tile_n

    if n_pad != n:
        prediction = jnp.pad(prediction, ((0, n_pad - n), (0, 0)))
        labels = jnp.pad(labels, ((0, n_pad - n),))
    labels2d = labels.astype(jnp.int32).reshape(n_pad, 1)

    vmem_limit = max(32 * 1024 * 1024, 2 * input_budget)

    # Advisory cost hint so XLA schedules producers around this mem-bound call.
    cost = pl.CostEstimate(
        flops=6 * n_pad * c,
        transcendentals=n_pad * c,
        bytes_accessed=n_pad * c * itemsize + n_pad * 4 + num_tiles * 8 * 128 * 4,
    )

    partials = pl.pallas_call(
        functools.partial(_ce_partial_kernel, true_n=n, tile_n=tile_n),
        out_shape=jax.ShapeDtypeStruct((num_tiles, 8, 128), jnp.float32),
        grid_spec=pltpu.PrefetchScalarGridSpec(
            num_scalar_prefetch=0,
            grid=(num_tiles,),
            in_specs=[
                pl.BlockSpec((tile_n, c), lambda i: (i, 0)),   # logits tile
                pl.BlockSpec((tile_n, 1), lambda i: (i, 0)),   # labels tile
            ],
            out_specs=pl.BlockSpec((1, 8, 128), lambda i: (i, 0, 0)),
        ),
        compiler_params=pltpu.CompilerParams(
            # Independent row-tiles -> shard the grid across TensorCores (v7x).
            dimension_semantics=("parallel",),
            vmem_limit_bytes=vmem_limit,
        ),
        cost_estimate=cost,
    )(prediction, labels2d)

    # Each tile broadcast its sum across its slab; lane/sublane 0 holds it.
    return jnp.sum(partials[:, 0, 0]) / jnp.float32(n)


if __name__ == "__main__":
    key = jax.random.PRNGKey(0)
    k1, k2 = jax.random.split(key)

    # Small shapes consistent with the module: batch N = 10 rows (not a
    # multiple of 8, to exercise row padding + masking), num_class C = 16.
    N, NUM_CLASS = 10, 16
    prediction = jax.random.normal(k1, (N, NUM_CLASS), dtype=jnp.float32)
    labels = jax.random.randint(k2, (N,), 0, NUM_CLASS, dtype=jnp.int32)

    loss = output_layer_loss(prediction, labels)
    jax.block_until_ready(loss)

    # Reference: torch nn.CrossEntropyLoss (mean reduction) semantics.
    lse = jax.scipy.special.logsumexp(prediction, axis=-1)
    ref = jnp.mean(lse - prediction[jnp.arange(N), labels])
    assert jnp.allclose(loss, ref, rtol=1e-5, atol=1e-5), (loss, ref)

    print("KERNEL_OK")
</pallas_src>

<mosaic_0001>
module attributes {stable_mosaic.version = 11 : i64} {
  func.func @_ce_partial_kernel(%arg0: i32, %arg1: memref<16x16xf32, #tpu.memory_space<vmem>>, %arg2: memref<16x1xi32, #tpu.memory_space<vmem>>, %arg3: memref<1x8x128xf32, #tpu.memory_space<vmem>>) attributes {dimension_semantics = [#tpu.dimension_semantics<parallel>], iteration_bounds = array<i64: 1>, scalar_prefetch = 0 : i64, scratch_operands = 0 : i64, tpu.core_type = #tpu.core_type<tc>, window_params = [{transform_indices = @transform_0, window_bounds = array<i64: 16, 16>}, {transform_indices = @transform_1, window_bounds = array<i64: 16, 1>}, {transform_indices = @transform_2, window_bounds = array<i64: 1, 8, 128>}]} {
    %c0 = arith.constant 0 : index
    %c0_0 = arith.constant 0 : index
    %0 = vector.load %arg1[%c0, %c0_0] : memref<16x16xf32, #tpu.memory_space<vmem>>, vector<16x16xf32>
    %c0_1 = arith.constant 0 : index
    %c0_2 = arith.constant 0 : index
    %1 = vector.load %arg2[%c0_1, %c0_2] : memref<16x1xi32, #tpu.memory_space<vmem>>, vector<16x1xi32>
    %cst = arith.constant dense<0xFF800000> : vector<16xf32>
    %2 = vector.multi_reduction <maximumf>, %0, %cst [1] : vector<16x16xf32> to vector<16xf32>
    %3 = vector.shape_cast %2 : vector<16xf32> to vector<16x1xf32>
    %4 = vector.broadcast %3 : vector<16x1xf32> to vector<16x16xf32>
    %5 = arith.subf %0, %4 : vector<16x16xf32>
    %6 = math.exp %5 : vector<16x16xf32>
    %cst_3 = arith.constant dense<0.000000e+00> : vector<16xf32>
    %7 = vector.multi_reduction <add>, %6, %cst_3 [1] : vector<16x16xf32> to vector<16xf32>
    %8 = vector.shape_cast %7 : vector<16xf32> to vector<16x1xf32>
    %9 = math.log %8 : vector<16x1xf32>
    %10 = arith.addf %3, %9 : vector<16x1xf32>
    %11 = tpu.iota {dimensions = array<i32: 1>} : vector<16x16xi32>
    %12 = vector.broadcast %1 : vector<16x1xi32> to vector<16x16xi32>
    %13 = arith.cmpi eq, %11, %12 : vector<16x16xi32>
    %14 = arith.extui %13 : vector<16x16xi1> to vector<16x16xi32>
    %15 = arith.sitofp %14 : vector<16x16xi32> to vector<16x16xf32>
    %16 = arith.mulf %0, %15 : vector<16x16xf32>
    %cst_4 = arith.constant dense<0.000000e+00> : vector<16xf32>
    %17 = vector.multi_reduction <add>, %16, %cst_4 [1] : vector<16x16xf32> to vector<16xf32>
    %18 = vector.shape_cast %17 : vector<16xf32> to vector<16x1xf32>
    %c16_i32 = arith.constant 16 : i32
    %19 = arith.muli %arg0, %c16_i32 : i32
    %20 = tpu.iota {dimensions = array<i32: 0>} : vector<16x1xi32>
    %21 = vector.broadcast %19 : i32 to vector<16x1xi32>
    %22 = arith.addi %21, %20 : vector<16x1xi32>
    %c10_i32 = arith.constant 10 : i32
    %23 = vector.broadcast %c10_i32 : i32 to vector<16x1xi32>
    %24 = arith.cmpi slt, %22, %23 : vector<16x1xi32>
    %25 = arith.extui %24 : vector<16x1xi1> to vector<16x1xi32>
    %26 = arith.sitofp %25 : vector<16x1xi32> to vector<16x1xf32>
    %27 = arith.subf %10, %18 : vector<16x1xf32>
    %28 = arith.mulf %27, %26 : vector<16x1xf32>
    %29 = vector.shape_cast %28 : vector<16x1xf32> to vector<1x16x1xf32>
    %cst_5 = arith.constant dense<0.000000e+00> : vector<1xf32>
    %30 = vector.multi_reduction <add>, %29, %cst_5 [1, 2] : vector<1x16x1xf32> to vector<1xf32>
    %31 = vector.shape_cast %30 : vector<1xf32> to vector<1x1x1xf32>
    %32 = vector.extract %31[0, 0, 0] : f32 from vector<1x1x1xf32>
    %33 = vector.broadcast %32 : f32 to vector<1x8x128xf32>
    %c0_6 = arith.constant 0 : index
    %c0_7 = arith.constant 0 : index
    %c0_8 = arith.constant 0 : index
    %34 = vector.load %arg3[%c0_6, %c0_7, %c0_8] : memref<1x8x128xf32, #tpu.memory_space<vmem>>, vector<1x8x128xf32>
    tpu.vector_store %arg3[%c0_6, %c0_7, %c0_8], %33 {strides = array<i32>} : memref<1x8x128xf32, #tpu.memory_space<vmem>>, vector<1x8x128xf32>,
    return
  }
  func.func @transform_0(%arg0: i32) -> (i32, i32) {
    %c0_i32 = arith.constant 0 : i32
    %c0_i32_0 = arith.constant 0 : i32
    return %arg0, %c0_i32 : i32, i32
  }
  func.func @transform_1(%arg0: i32) -> (i32, i32) {
    %c0_i32 = arith.constant 0 : i32
    %c0_i32_0 = arith.constant 0 : i32
    return %arg0, %c0_i32 : i32, i32
  }
  func.func @transform_2(%arg0: i32) -> (i32, i32, i32) {
    %c0_i32 = arith.constant 0 : i32
    %c0_i32_0 = arith.constant 0 : i32
    %c0_i32_1 = arith.constant 0 : i32
    return %arg0, %c0_i32, %c0_i32_0 : i32, i32, i32
  }
}

</mosaic_0001>

<bundles_post_ra>
// kernel: tpu_custom_call.1
= control target key start
LH: loop header
LB: loop body
LE: loop exit
PB: predicated region body
PF: predicated region fallthrough
CT: control target
= control target key end

     0   :  { %vm16_vm0 = vcmask 130048   ;;  %v151_v4 = vmov 0   ;;  %s199_s0 = inlined_call_operand.vmem [shape: f32[16,16], index: 0, kind: input, shape index: {}]   ;;  %s200_s1 = inlined_call_operand.vmem [shape: s32[16,1], index: 1, kind: input, shape index: {}]   ;;  %s201_s2 = inlined_call_operand.hbm [shape: f32[1,8,128], index: 2, kind: output, shape index: {}]  }
   0x1   :  { %v13_v0 = vld [vmem:[%s199_s0 + $0x8] sm:$0xff]  ;;  %v12_v1 = vld [vmem:[%s199_s0] sm:$0xff]  ;;  %117 = vset.pattern.permute.xlu1 %v151_v4  ;;  %118 = vset.pattern.permute.xlu0 %v151_v4 }
   0x2   :  { %v15_v2 = vld [vmem:[%s200_s1 + $0x8] sm:$0xff]  ;;  %v20_v3 = vsel %vm16_vm0, %v13_v0, -inf }
   0x3   :  { %7 = vsyncpa [#allocation3], 0  ;;  %21 = vmax.xlane.f32.xlu0 %v20_v3  ;;  %47 = vperm.xlu1 %117, %v15_v2   ;;  %v17_v5 = vsel %vm16_vm0, %v12_v1, -inf  ;;  %v14_v6 = vld [vmem:[%s200_s1] sm:$0xff]  ;;  %v41_v8 = vlaneseq  ;;  %v152_v17 = vmov 0.0   ;;  %vm80_vm4 = vcmask 7168  }
   0x4   :  { %s153_s0 = smov [#allocation2]  }
   0x5   :  { %v42_v13 = vand.u32 127, %v41_v8  ;;  %v65_v30 = vshrl.u32 %v41_v8, 7  ;;  %s101_s1 = sshll.u32 %s153_s0, 4  ;;  %s102_s1 = int_to_ptr.vmem [resolvable:$true] %s101_s1 }
   0x6   :  { %s127_s18 = scalar_lea.vmem %s102_s1, 128  ;;  %p132_p1 = scmp.lt.s32.totalorder %s102_s1, %s102_s1 }
   0x7   :  { %18 = vmax.xlane.f32.xlu0 %v17_v5  ;;  %44 = vperm.xlu1 %117, %v14_v6   ;;  %v66_v31 = vadd.s32 8, %v65_v30  ;;  %p128_p0 = scmp.ne.s32.totalorder %s102_s1, %s127_s18  ;;  %p133_p2 = scmp.lt.s32.totalorder %s127_s18, %s127_s18 }
   0x9   :  { %vm71_vm3 = vcmp.lt.s32.totalorder %v66_v31, 10  ;;  %p134_p3 = por %p133_p2, %p132_p1 }
   0xa   :  { %v111_v37 = vsel %vm71_vm3, 1.0, %v152_v17 }
   0xb   :  { %p135_p4 = pnand %p134_p3, %p128_p0 }
  0x82   :  { %v48_v11 = vpop.permute.xlu1 %47 }
  0x83   :  { %vm50_vm1 = vcmp.eq.s32.totalorder %v42_v13, %v48_v11 }
  0x84   :  { %v110_v18 = vsel %vm50_vm1, 1.0, %v152_v17 }
  0x85   :  { %v56_v19 = vmul.f32 %v110_v18, %v13_v0 }
  0x86   :  { %v45_v16 = vpop.permute.xlu1 %44 }
  0x87   :  { %vm49_vm2 = vcmp.eq.s32.totalorder %v42_v13, %v45_v16  ;;  %v60_v23 = vsel %vm16_vm0, %v56_v19, 0.0 }
  0x88   :  { %v109_v21 = vsel %vm49_vm2, 1.0, %v152_v17 }
  0x89   :  { %v55_v24 = vmul.f32 %v109_v21, %v12_v1 }
  0x8b   :  { %v57_v27 = vsel %vm16_vm0, %v55_v24, 0.0 }
  0x90   :  { %v22_v7 = vpop.xlane.xlu0 %21 }
  0x91   :  { %v24_v9 = vsub.f32 %v13_v0, %v22_v7 }
  0x93   :  { %v27_v10 = vmul.f32 1.442695, %v24_v9 }
  0x94   :  { %v19_v12 = vpop.xlane.xlu0 %18 }
  0x95   :  { %119 = vpow2.f32 %v27_v10  ;;  %v23_v14 = vsub.f32 %v12_v1, %v19_v12 }
  0x97   :  { %v25_v15 = vmul.f32 1.442695, %v23_v14 }
  0x99   :  { %121 = vpow2.f32 %v25_v15 }
  0x9f   :  { %v120_v20 = vpop.eup %119 }
  0xa0   :  { %v32_v22 = vsel %vm16_vm0, %v120_v20, 0.0 }
  0xa1   :  { %33 = vadd.xlane.f32.xlu0 %v32_v22 }
  0xa3   :  { %v122_v25 = vpop.eup %121 }
  0xa4   :  { %v29_v26 = vsel %vm16_vm0, %v122_v25, 0.0 }
  0xa5   :  { %30 = vadd.xlane.f32.xlu1 %v29_v26  ;;  %61 = vadd.xlane.f32.xlu0 %v60_v23 }
  0xa9   :  { %58 = vadd.xlane.f32.xlu0 %v57_v27 }
 0x12e   :  { %v34_v28 = vpop.xlane.xlu0 %33 }
 0x12f   :  { %123 = vlog2.f32 %v34_v28 }
 0x132   :  { %v31_v29 = vpop.xlane.xlu1 %30  ;;  %v62_v34 = vpop.xlane.xlu0 %61 }
 0x133   :  { %125 = vlog2.f32 %v31_v29 }
 0x136   :  { %v59_v42 = vpop.xlane.xlu0 %58 }
 0x139   :  { %v124_v32 = vpop.eup %123 }
 0x13a   :  { %v38_v33 = vmul.f32 0.6931472, %v124_v32 }
 0x13c   :  { %v40_v35 = vadd.f32 %v38_v33, %v22_v7 }
 0x13d   :  { %v126_v36 = vpop.eup %125 }
 0x13e   :  { %v36_v38 = vmul.f32 0.6931472, %v126_v36  ;;  %v77_v39 = vsub.f32 %v40_v35, %v62_v34 }
 0x140   :  { %v79_v40 = vmul.f32 %v111_v37, %v77_v39  ;;  %v39_v41 = vadd.f32 %v36_v38, %v19_v12 }
 0x142   :  { %v76_v43 = vsub.f32 %v39_v41, %v59_v42  ;;  %v82_v45 = vsel %vm80_vm4, %v79_v40, 0.0 }
 0x144   :  { %v81_v44 = vsel %vm80_vm4, %v76_v43, 0.0 }
 0x145   :  { %v83_v46 = vadd.f32 %v82_v45, %v81_v44 }
 0x147   :  { %84 = vadd.xlane.f32.xlu0 %v83_v46 }
 0x1d4   :  { %v85_v47 = vpop.xlane.xlu0 %84 }
 0x1d5   :  { %v86_v48 = vrot.slane %v85_v47, 4 }
 0x1d7   :  { %v87_v49 = vadd.f32 %v86_v48, %v85_v47 }
 0x1d9   :  { %v88_v50 = vrot.slane %v87_v49, 2 }
 0x1db   :  { %v89_v51 = vadd.f32 %v88_v50, %v87_v49 }
 0x1dd   :  { %v90_v52 = vrot.slane %v89_v51, 1 }
 0x1df   :  { %v91_v53 = vadd.f32 %v90_v52, %v89_v51 }
 0x1e1   :  { %112 = vpush %v91_v53 }
 0x212   :  { %s113_s17 = spop %112 }
 0x213   :  { %v93_v54 = vstv %s113_s17 }
 0x214   :  { %94 = vst [vmem:[#allocation2] sm:$0xff] %v93_v54 }
 0x215   :  { %138 = shalt.err (!%p135_p4)
}
 0x216   :  { %s139_s21 = scalar_lea.hbm %s201_s2, 128 }
 0x217   :  { %p140_p5 = scmp.ne.s32.totalorder %s201_s2, %s139_s21  ;;  %p143_p6 = scmp.lt.u32.totalorder %s139_s21, %s201_s2 }
 0x219   :  { %p145_p7 = pnand %p143_p6, %p140_p5 }
 0x21b   :  { %148 = shalt.err (!%p145_p7)
}
 0x21c   :  { %104 = dma.vmem_to_hbm [thread:$0]  %s102_s1, 128, %s201_s2, [#allocation3]  }
 0x21d   :  { %149 = dma.done.wait [#allocation3], 128  }
 0x21e   :  { %150 = vsyncadd [#allocation3], 4294967168 }
 0x21f   :  { %108 = vsyncpa [#allocation3], 1 }

</bundles_post_ra>
